<compile_context>
chip_gen: v7x
topology: tpu7x:2x2x1
jax: 0.10.0
libtpu: 0.0.40
codegen_flags: <defaults>
</compile_context>

<pallas_src>
import jax
import jax.numpy as jnp
from jax.experimental import pallas as pl
from jax.experimental.pallas import tpu as pltpu


def yolo_loss_kernel(pred_ref, tgt_ref, aux_ref, out_ref, acc_ref):
    """One (batch, anchor) slice per grid step.

    pred_ref : (K, HW)  raw logits, rows = [x, y, w, h, conf, cls_0..cls_{C-1}]
    tgt_ref  : (K, HW)  targets,   rows = [tx, ty, tw, th, tconf, tcls_0..]
    aux_ref  : (3, HW)  rows = [obj_mask, coodn_mask, coodn_mask*box_loss_scale]
    out_ref  : (3, HW)  per-batch lane-partial sums [loc, conf, cls]
    acc_ref  : (K, HW)  f32 scratch accumulator (resident across the anchor axis)
    """
    a = pl.program_id(1)

    @pl.when(a == 0)
    def _init():
        acc_ref[...] = jnp.zeros_like(acc_ref)

    z = pred_ref[...].astype(jnp.float32)          # (K, HW)
    t = tgt_ref[...]
    obj = aux_ref[0:1, :]                          # (1, HW)
    coodn = aux_ref[1:2, :]
    wloc = aux_ref[2:3, :]                         # coodn_mask * (2 - sx*sy)

    # --- localization (l2): (sigmoid-or-raw(z)*bls - t*bls)^2 on coodn==1 ---
    d_xy = wloc * (jax.nn.sigmoid(z[0:2, :]) - t[0:2, :])
    d_wh = wloc * (z[2:4, :] - t[2:4, :])
    acc_ref[0:2, :] += d_xy * d_xy
    acc_ref[2:4, :] += d_wh * d_wh

    # --- confidence + class BCE, sigmoid fused (logits form), dense slab ---
    zb = z[4:, :]                                  # (1+C, HW)
    tb = t[4:, :]
    bce = jnp.maximum(zb, 0.0) - zb * tb + jnp.log(1.0 + jnp.exp(-jnp.abs(zb)))
    acc_ref[4:5, :] += obj * bce[0:1, :]
    acc_ref[5:, :] += coodn * bce[1:, :]

    @pl.when(a == pl.num_programs(1) - 1)
    def _finalize():
        out_ref[0:1, :] = jnp.sum(acc_ref[0:4, :], axis=0, keepdims=True)  # loc
        out_ref[1:2, :] = acc_ref[4:5, :]                                  # conf
        out_ref[2:3, :] = jnp.sum(acc_ref[5:, :], axis=0, keepdims=True)   # cls


class YOLOLossPallas:
    """Functional re-implementation of pytorch_detectron YOLOLoss.forward."""

    def __init__(self, anchors, num_classes, img_size, label_smooth=0):
        self.anchors = jnp.asarray(anchors, dtype=jnp.float32)      # (9, 2) px
        self.num_anchors = len(anchors)
        self.num_classes = num_classes
        self.bbox_attrs = 5 + num_classes
        self.img_size = img_size
        self.feature_length = [img_size[0] // 32, img_size[0] // 16, img_size[0] // 8]
        self.label_smooth = label_smooth
        self.ignore_threshold = 0.5
        self.lambda_conf = 1.0
        self.lambda_cls = 1.0
        self.lambda_loc = 1.0
        # TODO(synk): iou_loss_mode='ciou' branch (box_ciou) not implemented;
        # the module's default 'l2' branch is reproduced.

    # --------------------------------------------------------------------- #
    def __call__(self, x, targets):
        bs, _, in_h, in_w = x.shape
        A = self.num_anchors // 3
        K = self.bbox_attrs
        HW = in_h * in_w

        scaled_anchors = jnp.stack(
            [self.anchors[:, 0] / self.img_size[0],
             self.anchors[:, 1] / self.img_size[1]], axis=-1)       # (9, 2)

        # NCHW (bs, A*K, H, W) -> (bs, A, K, H, W): pure reshape, no transpose.
        pred5 = x.reshape(bs, A, K, in_h, in_w)

        (obj_mask, coodn_mask, tx, ty, tw, th, tconf, tcls,
         blsx, blsy) = self._build_target(pred5, targets, scaled_anchors,
                                          in_w, in_h)

        box_loss_scale = 2.0 - blsx * blsy
        wloc = coodn_mask * box_loss_scale

        # Field-major slabs, HW on the lane axis (all free reshapes of freshly
        # built target tensors).
        tgt = jnp.concatenate(
            [jnp.stack([tx, ty, tw, th, tconf], axis=2), tcls], axis=2
        ).reshape(bs, A, K, HW)
        aux = jnp.stack([obj_mask, coodn_mask, wloc], axis=2).reshape(bs, A, 3, HW)
        pred_in = pred5.reshape(bs, A, K, HW)       # keep network dtype; cast in-kernel

        n_cells = bs * A * HW
        cost = pl.CostEstimate(
            flops=int(12 * K * n_cells),
            transcendentals=int((K - 2) * n_cells),
            bytes_accessed=int(4 * n_cells * (2 * K + 3) + 4 * bs * 3 * HW),
        )

        partials = pl.pallas_call(
            yolo_loss_kernel,
            out_shape=jax.ShapeDtypeStruct((bs, 3, HW), jnp.float32),
            grid=(bs, A),
            in_specs=[
                pl.BlockSpec((None, None, K, HW), lambda b, a: (b, a, 0, 0)),
                pl.BlockSpec((None, None, K, HW), lambda b, a: (b, a, 0, 0)),
                pl.BlockSpec((None, None, 3, HW), lambda b, a: (b, a, 0, 0)),
            ],
            out_specs=pl.BlockSpec((None, 3, HW), lambda b, a: (b, 0, 0)),
            scratch_shapes=[pltpu.VMEM((K, HW), jnp.float32)],
            compiler_params=pltpu.CompilerParams(
                dimension_semantics=("parallel", "arbitrary")),
            cost_estimate=cost,
        )(pred_in, tgt, aux)

        # Tiny final cross-lane reduction done by XLA in the wrapper.
        sums = jnp.sum(partials, axis=(0, 2))       # (3,) = [loc, conf, cls]
        loss_loc, loss_conf, loss_cls = sums[0], sums[1], sums[2]
        loss = (loss_conf * self.lambda_conf + loss_cls * self.lambda_cls
                + loss_loc * self.lambda_loc)
        return loss, loss_conf, loss_cls, loss_loc

    # --------------------------------------------------------------------- #
    def _build_target(self, pred5, targets, scaled_anchors_total, in_w, in_h):
        """Fully vectorized target assignment (no Python bs*T scatter loop)."""
        bs, A, K, H, W = pred5.shape
        C = self.num_classes
        T = targets.shape[1]
        layer = self.feature_length.index(in_w)
        a0 = 3 * layer                                           # anchor_index[0]
        scaled_anchors = scaled_anchors_total[a0:a0 + 3]          # (3, 2)

        px = jax.nn.sigmoid(pred5[:, :, 0].astype(jnp.float32))   # (bs,A,H,W)
        py = jax.nn.sigmoid(pred5[:, :, 1].astype(jnp.float32))
        pw = pred5[:, :, 2].astype(jnp.float32)
        ph = pred5[:, :, 3].astype(jnp.float32)

        grid_x = jnp.arange(in_w, dtype=jnp.float32)[None, None, None, :]
        grid_y = jnp.arange(in_h, dtype=jnp.float32)[None, None, :, None]
        anchor_w = scaled_anchors[:, 0][None, :, None, None]
        anchor_h = scaled_anchors[:, 1][None, :, None, None]

        pb_x = (px + grid_x) / in_w
        pb_y = (py + grid_y) / in_h
        pb_w = jnp.exp(pw) * anchor_w
        pb_h = jnp.exp(ph) * anchor_h

        # ---- ignore mask: jaccard IoU(gt, pred) > thresh  =>  obj_mask = 0 ----
        valid = targets[..., 4] != -1.0                           # (bs, T)
        gt = jnp.where(valid[..., None], targets[..., :4],
                       jnp.array([-1e4, -1e4, 1e-3, 1e-3], jnp.float32))

        M = A * H * W
        pb = jnp.stack([pb_x, pb_y, pb_w, pb_h], axis=-1).reshape(bs, M, 4)
        g_min = gt[..., :2] - gt[..., 2:4] / 2.0
        g_max = gt[..., :2] + gt[..., 2:4] / 2.0
        p_min = pb[..., :2] - pb[..., 2:4] / 2.0
        p_max = pb[..., :2] + pb[..., 2:4] / 2.0
        imin = jnp.maximum(g_min[:, :, None, :], p_min[:, None, :, :])
        imax = jnp.minimum(g_max[:, :, None, :], p_max[:, None, :, :])
        iwh = jnp.clip(imax - imin, 0.0)
        inter = iwh[..., 0] * iwh[..., 1]                          # (bs, T, M)
        area_g = (gt[..., 2] * gt[..., 3])[:, :, None]
        area_p = (pb[..., 2] * pb[..., 3])[:, None, :]
        iou = inter / (area_g + area_p - inter)
        ignore = jnp.any((iou > self.ignore_threshold) & valid[:, :, None], axis=1)
        obj_mask = jnp.where(ignore.reshape(bs, A, H, W), 0.0, 1.0)

        # ---- best-anchor assignment, vectorized over (bs, T) ----
        gx = targets[..., 0] * in_w
        gy = targets[..., 1] * in_h
        gw = targets[..., 2] * in_w
        gh = targets[..., 3] * in_h
        anch_wh = jnp.stack([scaled_anchors_total[:, 0] * in_w,
                             scaled_anchors_total[:, 1] * in_h], axis=-1)   # (9,2)
        inter_a = (jnp.minimum(gw[..., None], anch_wh[:, 0]) *
                   jnp.minimum(gh[..., None], anch_wh[:, 1]))               # (bs,T,9)
        union_a = gw[..., None] * gh[..., None] + anch_wh[:, 0] * anch_wh[:, 1] - inter_a
        anch_iou = inter_a / (union_a + 1e-16)
        best_n = jnp.argmax(anch_iou, axis=-1)                              # (bs,T)
        in_layer = (best_n >= a0) & (best_n < a0 + 3)
        cbn = jnp.clip(best_n - a0, 0, A - 1)
        gi = gx.astype(jnp.int32)      # truncation toward 0 matches int(gx)
        gj = gy.astype(jnp.int32)
        in_bounds = (gj < in_h) & (gi < in_w) & (gj >= 0) & (gi >= 0)
        do = valid & in_layer & in_bounds

        best_wh = anch_wh[best_n]                                           # (bs,T,2)
        val_tx = gx - gi.astype(jnp.float32)
        val_ty = gy - gj.astype(jnp.float32)
        val_tw = jnp.log(gw / best_wh[..., 0] + 1e-16)
        val_th = jnp.log(gh / best_wh[..., 1] + 1e-16)

        gi_c = jnp.clip(gi, 0, in_w - 1)
        gj_c = jnp.clip(gj, 0, in_h - 1)

        # deterministic last-write-wins for value fields (same batch, same cell)
        cell = (cbn * in_h + gj_c) * in_w + gi_c
        tri = jnp.triu(jnp.ones((T, T), dtype=bool), k=1)                   # t' > t
        later_same = (cell[:, :, None] == cell[:, None, :]) & do[:, None, :] & tri[None]
        do_val = do & ~jnp.any(later_same, axis=2)

        b_idx = jnp.broadcast_to(jnp.arange(bs)[:, None], (bs, T))
        b_set = jnp.where(do, b_idx, bs)        # out-of-range batch => dropped
        b_val = jnp.where(do_val, b_idx, bs)

        zeros4 = jnp.zeros((bs, A, in_h, in_w), jnp.float32)

        def scatter(base, bsel, val):
            return base.at[bsel, cbn, gj_c, gi_c].set(val, mode='drop')

        obj_mask = scatter(obj_mask, b_set, 1.0)    # assignment overrides ignore
        coodn_mask = scatter(zeros4, b_set, 1.0)
        tconf = scatter(zeros4, b_set, 1.0)
        tx = scatter(zeros4, b_val, val_tx)
        ty = scatter(zeros4, b_val, val_ty)
        tw = scatter(zeros4, b_val, val_tw)
        th = scatter(zeros4, b_val, val_th)
        blsx = scatter(zeros4, b_val, targets[..., 2])
        blsy = scatter(zeros4, b_val, targets[..., 3])

        cls_i = jnp.clip(targets[..., 4].astype(jnp.int32), 0, C - 1)
        tcls = jnp.zeros((bs, A, C, in_h, in_w), jnp.float32)      # field-major
        tcls = tcls.at[b_set, cbn, cls_i, gj_c, gi_c].set(1.0, mode='drop')

        return (obj_mask, coodn_mask, tx, ty, tw, th, tconf, tcls, blsx, blsy)


if __name__ == "__main__":
    # Deterministic configuration (no learnable params in this module).
    anchors = [(10, 13), (16, 30), (33, 23),
               (30, 61), (62, 45), (59, 119),
               (116, 90), (156, 198), (320, 310)]
    num_classes = 4
    img_size = (128, 128)          # feature_length = [4, 8, 16]; in_w=16 -> anchors [6,7,8]

    loss_fn = YOLOLossPallas(anchors, num_classes, img_size)
    forward = jax.jit(lambda xx, tt: loss_fn(xx, tt))

    bs, in_h, in_w = 2, 16, 16
    ch = 3 * (5 + num_classes)     # 27
    key = jax.random.PRNGKey(0)
    x = jax.random.normal(key, (bs, ch, in_h, in_w), dtype=jnp.float32) * 0.5

    # targets: (bs, T, 5) = [cx, cy, w, h, class] normalized to [0,1]; class -1 == padding
    targets = jnp.array([
        [[0.50, 0.50, 0.90, 0.85, 1.0],
         [0.20, 0.30, 0.10, 0.15, 2.0],
         [0.00, 0.00, 0.00, 0.00, -1.0]],
        [[0.70, 0.60, 0.95, 0.90, 0.0],
         [0.40, 0.80, 0.88, 0.80, 3.0],
         [0.10, 0.10, 0.05, 0.05, 1.0]],
    ], dtype=jnp.float32)

    loss, loss_conf, loss_cls, loss_loc = forward(x, targets)
    jax.block_until_ready(loss)
    print("KERNEL_OK")
</pallas_src>

<mosaic_0001>
module attributes {stable_mosaic.version = 11 : i64} {
  func.func @yolo_loss_kernel(%arg0: i32, %arg1: i32, %arg2: memref<1x1x9x256xf32, #tpu.memory_space<vmem>>, %arg3: memref<1x1x9x256xf32, #tpu.memory_space<vmem>>, %arg4: memref<1x1x3x256xf32, #tpu.memory_space<vmem>>, %arg5: memref<1x3x256xf32, #tpu.memory_space<vmem>>, %arg6: memref<9x256xf32, #tpu.memory_space<vmem>>) attributes {dimension_semantics = [#tpu.dimension_semantics<parallel>, #tpu.dimension_semantics<arbitrary>], iteration_bounds = array<i64: 2, 3>, scalar_prefetch = 0 : i64, scratch_operands = 1 : i64, tpu.core_type = #tpu.core_type<tc>, window_params = [{transform_indices = @transform_0, window_bounds = array<i64: 1, 1, 9, 256>}, {transform_indices = @transform_1, window_bounds = array<i64: 1, 1, 9, 256>}, {transform_indices = @transform_2, window_bounds = array<i64: 1, 1, 3, 256>}, {transform_indices = @transform_3, window_bounds = array<i64: 1, 3, 256>}]} {
    %c0_i32 = arith.constant 0 : i32
    %0 = arith.cmpi eq, %arg1, %c0_i32 : i32
    %1 = arith.extui %0 : i1 to i32
    %c0_i32_0 = arith.constant 0 : i32
    %2 = arith.cmpi ne, %1, %c0_i32_0 : i32
    scf.if %2 {
      %cst_36 = arith.constant 0.000000e+00 : f32
      %64 = vector.broadcast %cst_36 : f32 to vector<9x256xf32>
      %c0_37 = arith.constant 0 : index
      %c0_38 = arith.constant 0 : index
      %65 = vector.load %arg6[%c0_37, %c0_38] : memref<9x256xf32, #tpu.memory_space<vmem>>, vector<9x256xf32>
      tpu.vector_store %arg6[%c0_37, %c0_38], %64 {strides = array<i32>} : memref<9x256xf32, #tpu.memory_space<vmem>>, vector<9x256xf32>,
    } else {
    }
    %c0 = arith.constant 0 : index
    %c0_1 = arith.constant 0 : index
    %c0_2 = arith.constant 0 : index
    %c0_3 = arith.constant 0 : index
    %3 = vector.load %arg2[%c0, %c0_1, %c0_2, %c0_3] : memref<1x1x9x256xf32, #tpu.memory_space<vmem>>, vector<1x1x9x256xf32>
    %4 = vector.shape_cast %3 : vector<1x1x9x256xf32> to vector<9x256xf32>
    %c0_4 = arith.constant 0 : index
    %c0_5 = arith.constant 0 : index
    %c0_6 = arith.constant 0 : index
    %c0_7 = arith.constant 0 : index
    %5 = vector.load %arg3[%c0_4, %c0_5, %c0_6, %c0_7] : memref<1x1x9x256xf32, #tpu.memory_space<vmem>>, vector<1x1x9x256xf32>
    %6 = vector.shape_cast %5 : vector<1x1x9x256xf32> to vector<9x256xf32>
    %c0_8 = arith.constant 0 : index
    %c0_9 = arith.constant 0 : index
    %c0_10 = arith.constant 0 : index
    %c0_11 = arith.constant 0 : index
    %7 = vector.load %arg4[%c0_8, %c0_9, %c0_10, %c0_11] : memref<1x1x3x256xf32, #tpu.memory_space<vmem>>, vector<1x1x1x256xf32>
    %8 = vector.shape_cast %7 : vector<1x1x1x256xf32> to vector<1x256xf32>
    %c0_12 = arith.constant 0 : index
    %c0_13 = arith.constant 0 : index
    %c1 = arith.constant 1 : index
    %c0_14 = arith.constant 0 : index
    %9 = vector.load %arg4[%c0_12, %c0_13, %c1, %c0_14] : memref<1x1x3x256xf32, #tpu.memory_space<vmem>>, vector<1x1x1x256xf32>
    %10 = vector.shape_cast %9 : vector<1x1x1x256xf32> to vector<1x256xf32>
    %c0_15 = arith.constant 0 : index
    %c0_16 = arith.constant 0 : index
    %c2 = arith.constant 2 : index
    %c0_17 = arith.constant 0 : index
    %11 = vector.load %arg4[%c0_15, %c0_16, %c2, %c0_17] : memref<1x1x3x256xf32, #tpu.memory_space<vmem>>, vector<1x1x1x256xf32>
    %12 = vector.shape_cast %11 : vector<1x1x1x256xf32> to vector<1x256xf32>
    %13 = vector.extract_strided_slice %4 {offsets = [0, 0], sizes = [2, 256], strides = [1, 1]} : vector<9x256xf32> to vector<2x256xf32>
    %14 = arith.negf %13 : vector<2x256xf32>
    %15 = math.exp %14 : vector<2x256xf32>
    %cst = arith.constant 1.000000e+00 : f32
    %16 = vector.broadcast %cst : f32 to vector<2x256xf32>
    %17 = arith.addf %16, %15 : vector<2x256xf32>
    %18 = arith.divf %16, %17 : vector<2x256xf32>
    %19 = vector.extract_strided_slice %6 {offsets = [0, 0], sizes = [2, 256], strides = [1, 1]} : vector<9x256xf32> to vector<2x256xf32>
    %20 = arith.subf %18, %19 : vector<2x256xf32>
    %21 = vector.broadcast %12 : vector<1x256xf32> to vector<2x256xf32>
    %22 = arith.mulf %21, %20 : vector<2x256xf32>
    %23 = vector.extract_strided_slice %4 {offsets = [2, 0], sizes = [2, 256], strides = [1, 1]} : vector<9x256xf32> to vector<2x256xf32>
    %24 = vector.extract_strided_slice %6 {offsets = [2, 0], sizes = [2, 256], strides = [1, 1]} : vector<9x256xf32> to vector<2x256xf32>
    %25 = arith.subf %23, %24 : vector<2x256xf32>
    %26 = vector.broadcast %12 : vector<1x256xf32> to vector<2x256xf32>
    %27 = arith.mulf %26, %25 : vector<2x256xf32>
    %c0_18 = arith.constant 0 : index
    %c0_19 = arith.constant 0 : index
    %28 = vector.load %arg6[%c0_18, %c0_19] : memref<9x256xf32, #tpu.memory_space<vmem>>, vector<2x256xf32>
    %29 = arith.mulf %22, %22 : vector<2x256xf32>
    %30 = arith.addf %28, %29 : vector<2x256xf32>
    %c0_20 = arith.constant 0 : index
    %c0_21 = arith.constant 0 : index
    %31 = vector.load %arg6[%c0_20, %c0_21] : memref<9x256xf32, #tpu.memory_space<vmem>>, vector<2x256xf32>
    tpu.vector_store %arg6[%c0_20, %c0_21], %30 {strides = array<i32>} : memref<9x256xf32, #tpu.memory_space<vmem>>, vector<2x256xf32>,
    %c2_22 = arith.constant 2 : index
    %c0_23 = arith.constant 0 : index
    %32 = vector.load %arg6[%c2_22, %c0_23] : memref<9x256xf32, #tpu.memory_space<vmem>>, vector<2x256xf32>
    %33 = arith.mulf %27, %27 : vector<2x256xf32>
    %34 = arith.addf %32, %33 : vector<2x256xf32>
    %c2_24 = arith.constant 2 : index
    %c0_25 = arith.constant 0 : index
    %35 = vector.load %arg6[%c2_24, %c0_25] : memref<9x256xf32, #tpu.memory_space<vmem>>, vector<2x256xf32>
    tpu.vector_store %arg6[%c2_24, %c0_25], %34 {strides = array<i32>} : memref<9x256xf32, #tpu.memory_space<vmem>>, vector<2x256xf32>,
    %36 = vector.extract_strided_slice %4 {offsets = [4, 0], sizes = [5, 256], strides = [1, 1]} : vector<9x256xf32> to vector<5x256xf32>
    %37 = vector.extract_strided_slice %6 {offsets = [4, 0], sizes = [5, 256], strides = [1, 1]} : vector<9x256xf32> to vector<5x256xf32>
    %cst_26 = arith.constant 0.000000e+00 : f32
    %38 = vector.broadcast %cst_26 : f32 to vector<5x256xf32>
    %39 = arith.maximumf %36, %38 : vector<5x256xf32>
    %40 = arith.mulf %36, %37 : vector<5x256xf32>
    %41 = arith.subf %39, %40 : vector<5x256xf32>
    %42 = math.absf %36 : vector<5x256xf32>
    %cst_27 = arith.constant 0.000000e+00 : f32
    %43 = vector.broadcast %cst_27 : f32 to vector<5x256xf32>
    %44 = arith.subf %43, %42 : vector<5x256xf32>
    %45 = math.exp %44 : vector<5x256xf32>
    %cst_28 = arith.constant 1.000000e+00 : f32
    %46 = vector.broadcast %cst_28 : f32 to vector<5x256xf32>
    %47 = arith.addf %46, %45 : vector<5x256xf32>
    %48 = math.log %47 : vector<5x256xf32>
    %49 = arith.addf %41, %48 : vector<5x256xf32>
    %c4 = arith.constant 4 : index
    %c0_29 = arith.constant 0 : index
    %50 = vector.load %arg6[%c4, %c0_29] : memref<9x256xf32, #tpu.memory_space<vmem>>, vector<1x256xf32>
    %51 = vector.extract_strided_slice %49 {offsets = [0, 0], sizes = [1, 256], strides = [1, 1]} : vector<5x256xf32> to vector<1x256xf32>
    %52 = arith.mulf %8, %51 : vector<1x256xf32>
    %53 = arith.addf %50, %52 : vector<1x256xf32>
    %c4_30 = arith.constant 4 : index
    %c0_31 = arith.constant 0 : index
    %54 = vector.load %arg6[%c4_30, %c0_31] : memref<9x256xf32, #tpu.memory_space<vmem>>, vector<1x256xf32>
    tpu.vector_store %arg6[%c4_30, %c0_31], %53 {strides = array<i32>} : memref<9x256xf32, #tpu.memory_space<vmem>>, vector<1x256xf32>,
    %c5 = arith.constant 5 : index
    %c0_32 = arith.constant 0 : index
    %55 = vector.load %arg6[%c5, %c0_32] : memref<9x256xf32, #tpu.memory_space<vmem>>, vector<4x256xf32>
    %56 = vector.extract_strided_slice %49 {offsets = [1, 0], sizes = [4, 256], strides = [1, 1]} : vector<5x256xf32> to vector<4x256xf32>
    %57 = vector.broadcast %10 : vector<1x256xf32> to vector<4x256xf32>
    %58 = arith.mulf %57, %56 : vector<4x256xf32>
    %59 = arith.addf %55, %58 : vector<4x256xf32>
    %c5_33 = arith.constant 5 : index
    %c0_34 = arith.constant 0 : index
    %60 = vector.load %arg6[%c5_33, %c0_34] : memref<9x256xf32, #tpu.memory_space<vmem>>, vector<4x256xf32>
    tpu.vector_store %arg6[%c5_33, %c0_34], %59 {strides = array<i32>} : memref<9x256xf32, #tpu.memory_space<vmem>>, vector<4x256xf32>,
    %c2_i32 = arith.constant 2 : i32
    %61 = arith.cmpi eq, %arg1, %c2_i32 : i32
    %62 = arith.extui %61 : i1 to i32
    %c0_i32_35 = arith.constant 0 : i32
    %63 = arith.cmpi ne, %62, %c0_i32_35 : i32
    scf.if %63 {
      %c0_36 = arith.constant 0 : index
      %c0_37 = arith.constant 0 : index
      %64 = vector.load %arg6[%c0_36, %c0_37] : memref<9x256xf32, #tpu.memory_space<vmem>>, vector<4x256xf32>
      %cst_38 = arith.constant dense<0.000000e+00> : vector<256xf32>
      %65 = vector.multi_reduction <add>, %64, %cst_38 [0] : vector<4x256xf32> to vector<256xf32>
      %66 = vector.shape_cast %65 : vector<256xf32> to vector<1x256xf32>
      %c0_39 = arith.constant 0 : index
      %c0_40 = arith.constant 0 : index
      %c0_41 = arith.constant 0 : index
      %67 = vector.load %arg5[%c0_39, %c0_40, %c0_41] : memref<1x3x256xf32, #tpu.memory_space<vmem>>, vector<1x1x256xf32>
      %68 = vector.shape_cast %67 : vector<1x1x256xf32> to vector<1x256xf32>
      %69 = vector.shape_cast %66 : vector<1x256xf32> to vector<1x1x256xf32>
      tpu.vector_store %arg5[%c0_39, %c0_40, %c0_41], %69 {strides = array<i32>} : memref<1x3x256xf32, #tpu.memory_space<vmem>>, vector<1x1x256xf32>,
      %c4_42 = arith.constant 4 : index
      %c0_43 = arith.constant 0 : index
      %70 = vector.load %arg6[%c4_42, %c0_43] : memref<9x256xf32, #tpu.memory_space<vmem>>, vector<1x256xf32>
      %c0_44 = arith.constant 0 : index
      %c1_45 = arith.constant 1 : index
      %c0_46 = arith.constant 0 : index
      %71 = vector.load %arg5[%c0_44, %c1_45, %c0_46] : memref<1x3x256xf32, #tpu.memory_space<vmem>>, vector<1x1x256xf32>
      %72 = vector.shape_cast %71 : vector<1x1x256xf32> to vector<1x256xf32>
      %73 = vector.shape_cast %70 : vector<1x256xf32> to vector<1x1x256xf32>
      tpu.vector_store %arg5[%c0_44, %c1_45, %c0_46], %73 {strides = array<i32>} : memref<1x3x256xf32, #tpu.memory_space<vmem>>, vector<1x1x256xf32>,
      %c5_47 = arith.constant 5 : index
      %c0_48 = arith.constant 0 : index
      %74 = vector.load %arg6[%c5_47, %c0_48] : memref<9x256xf32, #tpu.memory_space<vmem>>, vector<4x256xf32>
      %cst_49 = arith.constant dense<0.000000e+00> : vector<256xf32>
      %75 = vector.multi_reduction <add>, %74, %cst_49 [0] : vector<4x256xf32> to vector<256xf32>
      %76 = vector.shape_cast %75 : vector<256xf32> to vector<1x256xf32>
      %c0_50 = arith.constant 0 : index
      %c2_51 = arith.constant 2 : index
      %c0_52 = arith.constant 0 : index
      %77 = vector.load %arg5[%c0_50, %c2_51, %c0_52] : memref<1x3x256xf32, #tpu.memory_space<vmem>>, vector<1x1x256xf32>
      %78 = vector.shape_cast %77 : vector<1x1x256xf32> to vector<1x256xf32>
      %79 = vector.shape_cast %76 : vector<1x256xf32> to vector<1x1x256xf32>
      tpu.vector_store %arg5[%c0_50, %c2_51, %c0_52], %79 {strides = array<i32>} : memref<1x3x256xf32, #tpu.memory_space<vmem>>, vector<1x1x256xf32>,
    } else {
    }
    return
  }
  func.func @transform_0(%arg0: i32, %arg1: i32) -> (i32, i32, i32, i32) {
    %c0_i32 = arith.constant 0 : i32
    %c0_i32_0 = arith.constant 0 : i32
    %c0_i32_1 = arith.constant 0 : i32
    return %arg0, %arg1, %c0_i32, %c0_i32_0 : i32, i32, i32, i32
  }
  func.func @transform_1(%arg0: i32, %arg1: i32) -> (i32, i32, i32, i32) {
    %c0_i32 = arith.constant 0 : i32
    %c0_i32_0 = arith.constant 0 : i32
    %c0_i32_1 = arith.constant 0 : i32
    return %arg0, %arg1, %c0_i32, %c0_i32_0 : i32, i32, i32, i32
  }
  func.func @transform_2(%arg0: i32, %arg1: i32) -> (i32, i32, i32, i32) {
    %c0_i32 = arith.constant 0 : i32
    %c0_i32_0 = arith.constant 0 : i32
    %c0_i32_1 = arith.constant 0 : i32
    return %arg0, %arg1, %c0_i32, %c0_i32_0 : i32, i32, i32, i32
  }
  func.func @transform_3(%arg0: i32, %arg1: i32) -> (i32, i32, i32) {
    %c0_i32 = arith.constant 0 : i32
    %c0_i32_0 = arith.constant 0 : i32
    %c0_i32_1 = arith.constant 0 : i32
    return %arg0, %c0_i32, %c0_i32_0 : i32, i32, i32
  }
}

</mosaic_0001>

<bundles_post_ra>
// kernel: _lambda_.1
= control target key start
LH: loop header
LB: loop body
LE: loop exit
PB: predicated region body
PF: predicated region fallthrough
CT: control target
= control target key end

     0   :  { %s797_s12 = smov 0   ;;  %s799_s13 = smov 0   ;;  %s947_s0 = inlined_call_operand.vmem [shape: f32[2,3,9,256], index: 0, kind: input, shape index: {}]   ;;  %s948_s1 = inlined_call_operand.vmem [shape: f32[2,3,9,256], index: 1, kind: input, shape index: {}]   ;;  %s949_s2 = inlined_call_operand.vmem [shape: f32[2,3,3,256], index: 2, kind: input, shape index: {}]   ;;  %s950_s3 = inlined_call_operand.vmem [shape: f32[2,3,256], index: 3, kind: output, shape index: {}]  }
   0x1   :  { %s801_s14 = smov 0   ;;  %s803_s15 = smov 0  }
   0x2   :  { %s805_s16 = smov 0  }
   0x3 LB: > { %s22_s17 = sadd.s32 1, %s765_s14  ;;  %s25_s18 = sadd.s32 1, %s769_s15  ;;  %s773_s16 = sphi %s805_s16, %s13_s16   ;;  %s769_s15 = sphi %s803_s15, %s956_s15   ;;  %s765_s14 = sphi %s801_s14, %s955_s14   ;;  %s761_s13 = sphi %s799_s13, %s954_s13   ;;  %s757_s12 = sphi %s797_s12, %s953_s12  }
   0x4   : > { %p23_p0 = scmp.ge.s32.totalorder %s22_s17, 3  ;;  %p647_p1 = scmp.ge.s32.totalorder %s773_s16, 1 }
   0x5   : > { %p187_p2 = scmp.lt.s32.totalorder %s773_s16, 7 }
   0x6   : > { %s958_s17 = smov (%p23_p0, %s22_s17), 0  ;;  %s960_s18 = smov (!%p23_p0, %s25_s18), %s769_s15 }
   0x7   : > { %p188_p3 = pnand %p647_p1, %p187_p2  ;;  %p27_p4 = scmp.ge.s32.totalorder %s960_s18, 2 }
   0x8   : > { %p233_p5 = scmp.lt.s32.totalorder (!%p188_p3), %s761_s13, 1  ;;  %p235_p6 = scmp.lt.s32.totalorder (!%p188_p3), %s757_s12, 2 }
   0x9   : > { %s962_s18 = smov (%p27_p4, %s960_s18), 0  ;;  %191 = sbr.rel (%p188_p3) target bundleno = 112 (0x70), region = 32 }
   0xa   : > { %p656_p7 = scmp.ne.s32.totalorder (!%p188_p3), %s757_s12, 0 }
  0x10   : > { %s964_s13 = smov (!%p233_p5, %s761_s13), 1  ;;  %v775_v0 = vmov (!%p656_p7), 0.0  }
  0x11   : > { %s236_s19 = scalar_select %p235_p6, %s757_s12, 2 }
  0x12   : > { %s667_s20 = smul.u32 12, %s964_s13  ;;  %s666_s21 = sshll.u32 %s964_s13, 3  ;;  %269 = vst [vmem:[#allocation2] sm:$0xff] (!%p656_p7), %v775_v0  ;;  %270 = vst [vmem:[#allocation2 + $0x8] sm:$0xff] (!%p656_p7), %v775_v0 }
  0x13   : > { %s648_s22 = sshll.u32 %s236_s19, 2  ;;  %s652_s23 = sshll.u32 %s236_s19, 1  ;;  %271 = vst [vmem:[#allocation2 + $0x10] sm:$0x1] (!%p656_p7), %v775_v0  ;;  %272 = vst [vmem:[#allocation2 + $0x18] sm:$0x1] (!%p656_p7), %v775_v0 }
  0x14   : > { %s239_s24 = sadd.s32 %s667_s20, %s648_s22  ;;  %s668_s25 = smul.u32 6, %s964_s13 }
  0x15   : > { %s649_s26 = sshll.u32 %s239_s24, 3  ;;  %s834_s29 = scalar_lea.vmem %s950_s3, %s666_s21 }
  0x16   : > { %s839_s5 = scalar_lea.vmem %s947_s0, %s649_s26  ;;  %s844_s8 = scalar_lea.vmem %s948_s1, %s649_s26 }
  0x17   : > { %s257_s9 = sadd.s32 %s668_s25, %s652_s23  ;;  %268 = sbr.rel (%p656_p7) target bundleno = 30 (0x1e), region = 36 }
  0x18   : > { %s653_s10 = sshll.u32 %s257_s9, 2 }
  0x19   : > { %s849_s19 = scalar_lea.vmem %s949_s2, %s653_s10 }
  0x1e PF: > { %v853_v1 = vld [vmem:[%s839_s5] sm:$0xff]  ;;  %v301_v2 = vlaneseq  ;;  %v857_v4 = vld [vmem:[%s839_s5 + $0x8] sm:$0xff]  ;;  %v877_v23 = vld [vmem:[%s839_s5 + $0x10] sm:$0x1]  ;;  %v776_v60 = vmov 1966171168  }
  0x1f   : > { %v659_v3 = vmul.f32 -1.442695, %v853_v1  ;;  %v277_v5 = vld [vmem:[%s844_s8] sm:$0xff]  ;;  %v660_v7 = vmul.f32 -1.442695, %v857_v4  ;;  %v278_v9 = vld [vmem:[%s844_s8 + $0x8] sm:$0xff]  ;;  %v383_v61 = vunpack.c.l.s4 %v776_v60 }
  0x20   : > { %v861_v6 = vshrl.u32 %v301_v2, 7  ;;  %v658_v8 = vld [vmem:[%s849_s19 + $0x2] ss:$4 sm:$0x3]  ;;  %v313_v10 = vsub.f32 %v853_v1, %v277_v5  ;;  %v314_v13 = vsub.f32 %v857_v4, %v278_v9  ;;  %v345_v14 = vand.u32 2147483647, %v853_v1 }
  0x21   : > { %711 = vpow2.f32 %v659_v3  ;;  %v346_v15 = vand.u32 2147483647, %v857_v4  ;;  %v325_v21 = vld [vmem:[#allocation2] sm:$0xc]  ;;  %v326_v24 = vld [vmem:[#allocation2 + $0x8] sm:$0xc]  ;;  %v337_v54 = vmul.f32 %v277_v5, %v853_v1  ;;  %v338_v59 = vmul.f32 %v278_v9, %v857_v4 }
  0x22   : > { %v303_v11 = vsub.s32 0, %v861_v6  ;;  %713 = vpow2.f32 %v660_v7  ;;  %v307_v12 = vsub.s32 1, %v861_v6  ;;  %v349_v18 = vsub.f32 0.0, %v345_v14  ;;  %v880_v29 = vld [vmem:[%s839_s5 + $0x18] sm:$0x1]  ;;  %p661_p8 = scmp.ne.s32.totalorder %s757_s12, 2 }
  0x23   : > { %v350_v19 = vsub.f32 0.0, %v346_v15  ;;  %v347_v30 = vand.u32 2147483647, %v877_v23  ;;  %v348_v35 = vand.u32 2147483647, %v880_v29  ;;  %v333_v50 = vmax.f32 %v853_v1, 0.0 }
  0x24   : > { %v304_v16 = vrot.slane %v658_v8, %v303_v11  ;;  %v308_v17 = vrot.slane %v658_v8, %v307_v12  ;;  %v353_v25 = vmul.f32 1.442695, %v349_v18  ;;  %v334_v55 = vmax.f32 %v857_v4, 0.0  ;;  %v317_v57 = vld [vmem:[#allocation2] sm:$0x3] }
  0x25   : > { %v355_v26 = vmul.f32 1.442695, %v350_v19  ;;  %v351_v34 = vsub.f32 0.0, %v347_v30  ;;  %v352_v40 = vsub.f32 0.0, %v348_v35  ;;  %v318_v0 = vld [vmem:[#allocation2 + $0x8] sm:$0x3]  ;;  %v341_v1 = vsub.f32 %v333_v50, %v337_v54 }
  0x26   : > { %v315_v20 = vmul.f32 %v313_v10, %v304_v16  ;;  %v316_v22 = vmul.f32 %v314_v13, %v308_v17  ;;  %715 = vpow2.f32 %v353_v25  ;;  %v657_v7 = vld [vmem:[%s849_s19 + $0x1] ss:$4 sm:$0x3]  ;;  %v342_v14 = vsub.f32 %v334_v55, %v338_v59  ;;  %v406_v30 = vld [vmem:[#allocation2 + $0x8] sm:$0xe0] }
  0x27   : > { %717 = vpow2.f32 %v355_v26  ;;  %v357_v39 = vmul.f32 1.442695, %v351_v34  ;;  %v359_v41 = vmul.f32 1.442695, %v352_v40  ;;  %v384_v15 = vunpack.c.0.s8 %v383_v61 }
  0x28   : > { %v327_v27 = vmul.f32 %v315_v20, %v315_v20  ;;  %v328_v28 = vmul.f32 %v316_v22, %v316_v22  ;;  %v417_v19 = vrot.slane %v657_v7, %v307_v12  ;;  %v335_v20 = vmax.f32 %v877_v23, 0.0 }
  0x29   : > { %vm906_vm0 = vcmp.lt.s32.totalorder %v301_v2, 256  ;;  %vm438_vm1 = vcmask (!%p661_p8), 1043456   ;;  %vm483_vm2 = vcmask (!%p661_p8), 1042432  }
  0x2a   : > { %v329_v31 = vadd.f32 %v327_v27, %v325_v21  ;;  %v330_v32 = vadd.f32 %v328_v28, %v326_v24  ;;  %v336_v24 = vmax.f32 %v880_v29, 0.0  ;;  %v900_v27 = vsub.s32 %v384_v15, %v861_v6 }
  0x2b   : > { %v712_v33 = vpop.eup %711 }
  0x2c   : > { %v714_v36 = vpop.eup %713  ;;  %v292_v37 = vadd.f32 1.0, %v712_v33  ;;  %331 = vst [vmem:[#allocation2] sm:$0xc] %v329_v31  ;;  %332 = vst [vmem:[#allocation2 + $0x8] sm:$0xc] %v330_v32 }
  0x2d   : > { %v293_v38 = vadd.f32 1.0, %v714_v36 }
  0x2e   : > { %719 = vrcp.f32 %v292_v37 }
  0x2f   : > { %721 = vrcp.f32 %v293_v38 }
  0x30   : > { %723 = vpow2.f32 %v357_v39  ;;  %v716_v42 = vpop.eup %715 }
  0x31   : > { %725 = vpow2.f32 %v359_v41  ;;  %v718_v43 = vpop.eup %717  ;;  %v361_v44 = vadd.f32 1.0, %v716_v42  ;;  %v378_v41 = vld [vmem:[#allocation2 + $0x4] ss:$8 sm:$0x3]  ;;  %v407_v42 = vld [vmem:[#allocation2 + $0x10] sm:$0x1] }
  0x32   : > { %v362_v45 = vadd.f32 1.0, %v718_v43 }
  0x33   : > { %727 = vlog2.f32 %v361_v44 }
  0x34   : > { %729 = vlog2.f32 %v362_v45 }
  0x38   : > { %v720_v46 = vpop.eup %719 }
  0x39   : > { %v722_v47 = vpop.eup %721  ;;  %v298_v48 = vsub.f32 %v720_v46, %v277_v5  ;;  %v279_v5 = vld [vmem:[%s844_s8 + $0x10] sm:$0x1]  ;;  %v408_v46 = vld [vmem:[#allocation2 + $0x18] sm:$0x1] }
  0x3a   : > { %v724_v49 = vpop.eup %723  ;;  %v299_v51 = vsub.f32 %v722_v47, %v278_v9  ;;  %v413_v9 = vrot.slane %v657_v7, %v303_v11  ;;  %v339_v21 = vmul.f32 %v279_v5, %v877_v23  ;;  %v405_v11 = vld [vmem:[#allocation2] sm:$0xe0] }
  0x3b   : > { %v726_v52 = vpop.eup %725  ;;  %v311_v53 = vmul.f32 %v304_v16, %v298_v48  ;;  %v363_v56 = vadd.f32 1.0, %v724_v49  ;;  %v280_v16 = vld [vmem:[%s844_s8 + $0x18] sm:$0x1] }
  0x3c   : > { %v312_v58 = vmul.f32 %v308_v17, %v299_v51  ;;  %v364_v62 = vadd.f32 1.0, %v726_v52  ;;  %v340_v25 = vmul.f32 %v280_v16, %v880_v29  ;;  %v343_v12 = vsub.f32 %v335_v20, %v339_v21  ;;  %v281_v29 = vld [vmem:[%s849_s19] ss:$4 sm:$0x3] }
  0x3d   : > { %v319_v63 = vmul.f32 %v311_v53, %v311_v53  ;;  %731 = vlog2.f32 %v363_v56  ;;  %v728_v10 = vpop.eup %727 }
  0x3e   : > { %v320_v3 = vmul.f32 %v312_v58, %v312_v58  ;;  %733 = vlog2.f32 %v364_v62  ;;  %v730_v17 = vpop.eup %729  ;;  %v366_v4 = vmul.f32 0.6931472, %v728_v10  ;;  %v344_v35 = vsub.f32 %v336_v24, %v340_v25 }
  0x3f   : > { %v321_v8 = vadd.f32 %v319_v63, %v317_v57  ;;  %v368_v18 = vmul.f32 0.6931472, %v730_v17 }
  0x40   : > { %v322_v13 = vadd.f32 %v320_v3, %v318_v0  ;;  %v373_v22 = vadd.f32 %v366_v4, %v341_v1 }
  0x41   : > { %323 = vst [vmem:[#allocation2] sm:$0x3] %v321_v8  ;;  %v374_v26 = vadd.f32 %v368_v18, %v342_v14 }
  0x42   : > { %324 = vst [vmem:[#allocation2 + $0x8] sm:$0x3] %v322_v13  ;;  %v420_v28 = vmul.f32 %v413_v9, %v373_v22 }
  0x43   : > { %v381_v31 = vcombine.high %v373_v22, %v374_v26  ;;  %v421_v32 = vmul.f32 %v417_v19, %v374_v26 }
  0x44   : > { %v424_v34 = vadd.f32 %v420_v28, %v405_v11 }
  0x45   : > { %v388_v36 = vrot.slane %v381_v31, %v900_v27  ;;  %v425_v37 = vadd.f32 %v421_v32, %v406_v30 }
  0x46   : > { %428 = vst [vmem:[#allocation2] sm:$0xe0] %v424_v34 }
  0x47   : > { %v732_v33 = vpop.eup %731  ;;  %v395_v6 = vrot.slane %v388_v36, %v900_v27  ;;  %429 = vst [vmem:[#allocation2 + $0x8] sm:$0xe0] %v425_v37 }
  0x48   : > { %v734_v23 = vpop.eup %733  ;;  %v370_v38 = vmul.f32 0.6931472, %v732_v33  ;;  %v436_v52 = vld [vmem:[#allocation2] sm:$0xf] (!%p661_p8) }
  0x49   : > { %v372_v39 = vmul.f32 0.6931472, %v734_v23  ;;  %v397_v44 = vmul.f32 %v395_v6, %v281_v29  ;;  %v437_v53 = vld [vmem:[#allocation2 + $0x8] sm:$0xf] (!%p661_p8)  ;;  %v439_v2 = vsel (!%p661_p8), %vm438_vm1, %v436_v52, 0.0 }
  0x4a   : > { %v375_v40 = vadd.f32 %v370_v38, %v343_v12  ;;  %v446_v54 = vsel (!%p661_p8), %vm438_vm1, %v437_v53, 0.0  ;;  %v440_v56 = vrot.slane (!%p661_p8), %v439_v2, 4 }
  0x4b   : > { %v376_v43 = vadd.f32 %v372_v39, %v344_v35  ;;  %v398_v49 = vadd.f32 %v397_v44, %v378_v41  ;;  %435 = sbr.rel (%p661_p8) target bundleno = 112 (0x70), region = 40  ;;  %v447_v57 = vrot.slane (!%p661_p8), %v446_v54, 4 }
  0x4c   : > { %v422_v45 = vmul.f32 %v413_v9, %v375_v40  ;;  %v441_v0 = vadd.f32 (!%p661_p8), %v440_v56, %v439_v2 }
  0x4d   : > { %v423_v48 = vmul.f32 %v417_v19, %v376_v43  ;;  %403 = vst.msk [vmem:[#allocation2 + $0x4] ss:$8 sm:$0x3] %vm906_vm0, %v398_v49  ;;  %v475_v58 = vld [vmem:[#allocation2] sm:$0xe0] (!%p661_p8)  ;;  %v448_v3 = vadd.f32 (!%p661_p8), %v447_v57, %v446_v54 }
  0x4e   : > { %v426_v50 = vadd.f32 %v422_v45, %v407_v42  ;;  %v476_v59 = vld [vmem:[#allocation2 + $0x8] sm:$0xe0] (!%p661_p8)  ;;  %v484_v62 = vrot.slane (!%p661_p8), %v475_v58, 5  ;;  %v442_v1 = vrot.slane (!%p661_p8), %v441_v0, 2 }
  0x4f   : > { %v427_v51 = vadd.f32 %v423_v48, %v408_v46  ;;  %v487_v63 = vrot.slane (!%p661_p8), %v476_v59, 5  ;;  %v449_v5 = vrot.slane (!%p661_p8), %v448_v3, 2 }
  0x50   : > { %430 = vst [vmem:[#allocation2 + $0x10] sm:$0x1] %v426_v50  ;;  %v443_v16 = vadd.f32 (!%p661_p8), %v442_v1, %v441_v0 }
  0x51   : > { %431 = vst [vmem:[#allocation2 + $0x18] sm:$0x1] %v427_v51  ;;  %v450_v17 = vadd.f32 (!%p661_p8), %v449_v5, %v448_v3 }
  0x52   : > { %v444_v18 = vrot.slane %v443_v16, 1 }
  0x53   : > { %v451_v19 = vrot.slane %v450_v17, 1 }
  0x54   : > { %v472_v55 = vld [vmem:[#allocation2 + $0x4] ss:$8 sm:$0x3]  ;;  %v445_v22 = vadd.f32 %v444_v18, %v443_v16 }
  0x55   : > { %662 = vst.msk [vmem:[%s834_s29 + $0x1] ss:$4 sm:$0x3] %vm906_vm0, %v472_v55  ;;  %v452_v24 = vadd.f32 %v451_v19, %v450_v17 }
  0x57   : > { %v477_v60 = vld [vmem:[#allocation2 + $0x10] sm:$0x1]  ;;  %v455_v11 = vcombine.low %v445_v22, %v452_v24 }
  0x58   : > { %v478_v61 = vld [vmem:[#allocation2 + $0x18] sm:$0x1]  ;;  %v485_v7 = vrot.slane %v477_v60, 5 }
  0x59   : > { %v488_v8 = vrot.slane %v478_v61, 5  ;;  %v462_v31 = vrot.slane %v455_v11, %v900_v27 }
  0x5a   : > { %v486_v10 = vsel %vm483_vm2, %v484_v62, %v485_v7 }
  0x5b   : > { %v489_v13 = vsel %vm483_vm2, %v487_v63, %v488_v8  ;;  %v492_v14 = vsel %vm438_vm1, %v486_v10, 0.0  ;;  %v469_v33 = vrot.slane %v462_v31, %v900_v27 }
  0x5c   : > { %v499_v15 = vsel %vm438_vm1, %v489_v13, 0.0  ;;  %v493_v4 = vrot.slane %v492_v14, 4 }
  0x5d   : > { %v500_v9 = vrot.slane %v499_v15, 4  ;;  %471 = vst.msk [vmem:[%s834_s29] ss:$4 sm:$0x3] %vm906_vm0, %v469_v33 }
  0x5e   : > { %v494_v20 = vadd.f32 %v493_v4, %v492_v14 }
  0x5f   : > { %v501_v21 = vadd.f32 %v500_v9, %v499_v15 }
  0x60   : > { %v495_v25 = vrot.slane %v494_v20, 2 }
  0x61   : > { %v502_v26 = vrot.slane %v501_v21, 2 }
  0x62   : > { %v496_v28 = vadd.f32 %v495_v25, %v494_v20 }
  0x63   : > { %v503_v30 = vadd.f32 %v502_v26, %v501_v21 }
  0x64   : > { %v497_v32 = vrot.slane %v496_v28, 1 }
  0x65   : > { %v504_v12 = vrot.slane %v503_v30, 1 }
  0x66   : > { %v498_v34 = vadd.f32 %v497_v32, %v496_v28 }
  0x67   : > { %v505_v35 = vadd.f32 %v504_v12, %v503_v30 }
  0x69   : > { %v508_v23 = vcombine.low %v498_v34, %v505_v35 }
  0x6b   : > { %v515_v36 = vrot.slane %v508_v23, %v900_v27 }
  0x6d   : > { %v522_v37 = vrot.slane %v515_v36, %v900_v27 }
  0x6f   : > { %663 = vst.msk [vmem:[%s834_s29 + $0x2] ss:$4 sm:$0x3] %vm906_vm0, %v522_v37 }
  0x70 PF: > { %s13_s16 = sadd.s32 1, %s773_s16   ;;  %s953_s12 = smov %s765_s14 }
  0x71   : > { %p10_p9 = scmp.ge.s32.totalorder %s13_s16, 8   ;;  %s954_s13 = smov %s769_s15 }
  0x72   : > { %s955_s14 = smov %s958_s17  ;;  %s956_s15 = smov %s962_s18 }
  0x73   :  { %12 = sbr.rel (!%p10_p9) target bundleno = 3 (0x3), region = 81 }

</bundles_post_ra>
